<compile_context>
chip_gen: v6e
topology: v6e:2x2x1
jax: 0.10.0
libtpu: 0.0.40
codegen_flags: <defaults>
</compile_context>

<pallas_src>
import math

import jax
import jax.numpy as jnp
from jax.experimental import pallas as pl
from jax.experimental.pallas import tpu as pltpu

_HALF_LOG_2PI = 0.5 * math.log(2.0 * math.pi)
_SEG_ROWS = 8  # segment matrix padded to a full sublane group for the MXU


def _softplus(x):
    # Matches torch.nn.functional.softplus(beta=1, threshold=20):
    #   x             if x > 20
    #   log1p(exp(x)) otherwise
    safe_x = jnp.minimum(x, 20.0)
    return jnp.where(x > 20.0, x, jnp.log1p(jnp.exp(safe_x)))


# ---------------------------------------------------------------------------
# Forward: the distribution is fully defined by (loc, scale).
#   loc   = mean                        -> returned as-is (no copy kernel)
#   scale = softplus(scale_param)[None] -> plain JAX (XLA fuses it for free)
# ---------------------------------------------------------------------------
def independent_normal_forward(mean, scale_param):
    B, D = mean.shape
    assert scale_param.shape == (D,)
    # Per review: a Pallas call for a [1, D] softplus is ~us of launch overhead
    # for nanoseconds of work. Keep it in plain JAX.
    return mean, _softplus(scale_param.astype(jnp.float32))[None, :]


# ---------------------------------------------------------------------------
# log_prob of the Independent Normal (reinterpreted_batch_ndims = 1):
#   log N(x | loc, sigma) summed over the event dim -> shape [B]
# ---------------------------------------------------------------------------
def _log_prob_sums_kernel(x_ref, mean_ref, inv_scale_ref, seg_ref, out_ref):
    # Per-element body: one sub + one mul + one square on the VPU.
    x = x_ref[...].astype(jnp.float32)            # [tb_p, d_p]
    mu = mean_ref[...].astype(jnp.float32)        # [tb_p, d_p]
    z = (x - mu) * inv_scale_ref[...]             # [tb_p, d_p]
    # Segmented per-row reduction on the MXU (seg is a 0/1 matrix; this is the
    # same contracted-last-dims form as attention's q @ k.T). Result [8, tb_p]
    # is lane-dense: original-row sums land along the lane axis, so the output
    # store is unmasked instead of tb/8 masked vst.msk ops.
    sums = jax.lax.dot_general(
        seg_ref[...], z * z,
        dimension_numbers=(((1,), (1,)), ((), ())),
        preferred_element_type=jnp.float32)       # [8, tb_p]
    out_ref[...] = sums[None]                     # [1, 8, tb_p]


def _vmem_budget_and_limit():
    # v5e/v6e have 128 MiB physical VMEM -> large tiles amortize the ~0.35 us
    # per-step pipeline overhead; v7x has only 64 MiB -> stay conservative.
    try:
        phys = int(pltpu.get_tpu_info().vmem_capacity_bytes)
    except Exception:
        phys = 64 * 1024 * 1024
    if phys >= 128 * 1024 * 1024:
        return 24 * 1024 * 1024, 96 * 1024 * 1024
    return 8 * 1024 * 1024, 32 * 1024 * 1024


def _choose_block_rows(b_p, d_p, requested_p, in_itemsize, budget_bytes):
    """Pick packed rows per tile from a real VMEM footprint estimate."""
    # d_p is already a multiple of 128 (packed or zero-padded), so the lane
    # footprint below is exact, and we use the true input itemsize:
    #   2 tiled inputs x 2 pipeline buffers x d_p x itemsize   per packed row
    # + 2 buffers of the (8, tb_p) f32 output (64 B / packed row)
    # + d_p f32 of slack for in-kernel f32 temporaries (z, z*z).
    per_row = 2 * 2 * d_p * in_itemsize + 2 * _SEG_ROWS * 4 + d_p * 4
    fit = max(8, budget_bytes // per_row)
    tb = int(min(requested_p, fit, b_p))
    if b_p >= 16:
        # Keep at least 2 grid blocks so v7x's 2 TensorCores both get work
        # (costs at most one extra ~0.35 us step on single-TC v5e/v6e).
        half = (b_p + 1) // 2
        tb = min(tb, max(8, ((half + 7) // 8) * 8))
    if tb < b_p:
        tb = max(8, (tb // 8) * 8)  # (8, 128) tiling rule unless full-batch block
    return tb


def independent_normal_log_prob(x, mean, scale_param, *, block_rows=1024):
    """log_prob(x) under Independent(Normal(mean, softplus(scale)[None]), 1) -> [B]."""
    B, D = mean.shape
    assert x.shape == (B, D) and scale_param.shape == (D,)

    # ---- x-independent math, hoisted (tiny [D] vectors; XLA fuses) ----
    sigma = _softplus(scale_param.astype(jnp.float32))        # [D]
    inv_sigma = 1.0 / sigma                                   # exact f32 1/sigma
    const = -jnp.sum(jnp.log(sigma)) - D * _HALF_LOG_2PI      # scalar, added post-kernel

    # ---- lane packing / padding so every vreg lane carries useful data ----
    if D <= 128 and 128 % D == 0 and B % (128 // D) == 0:
        # Free, row-major-contiguous reshape: [B, D] -> [B/pack, 128].
        pack = 128 // D
        d_p = 128
        x_p = x.reshape(B // pack, d_p)
        mean_p = mean.reshape(B // pack, d_p)
        inv_p = jnp.tile(inv_sigma, pack)[None, :]            # [1, 128]
    else:
        # Fallback: zero-pad the feature dim to a lane multiple. Padded
        # features contribute (0 - 0) * 0 = 0 to the row sum (exact).
        pack = 1
        d_p = ((D + 127) // 128) * 128
        x_p = jnp.pad(x, ((0, 0), (0, d_p - D)))
        mean_p = jnp.pad(mean, ((0, 0), (0, d_p - D)))
        inv_p = jnp.pad(inv_sigma, (0, d_p - D))[None, :]
    b_p = B // pack

    # Segmented-reduction matrix: row s selects the lanes belonging to original
    # row s within a packed row; padded to 8 rows (zeros) for a sublane-full
    # MXU operand. For pack == 1 this is just a row of ones (plain row sum).
    d_seg = d_p // pack
    lane = jnp.arange(d_p)
    row = jnp.arange(_SEG_ROWS)
    seg = (((lane[None, :] // d_seg) == row[:, None])
           & (row[:, None] < pack)).astype(jnp.float32)       # [8, d_p]

    budget, vmem_limit = _vmem_budget_and_limit()
    req_p = max(1, block_rows // pack)
    tb_p = _choose_block_rows(b_p, d_p, req_p, x.dtype.itemsize, budget)
    nb = pl.cdiv(b_p, tb_p)
    # TODO(synk): for very large D add a second ("arbitrary") grid axis over
    # the feature dim with a VMEM row-sum accumulator instead of letting tb_p
    # clamp to 8 / overflow VMEM on v7x's 64 MiB part.

    sums = pl.pallas_call(
        _log_prob_sums_kernel,
        out_shape=jax.ShapeDtypeStruct((nb, _SEG_ROWS, tb_p), jnp.float32),
        grid=(nb,),
        in_specs=[
            pl.BlockSpec((tb_p, d_p), lambda i: (i, 0)),        # x     (tiled over B)
            pl.BlockSpec((tb_p, d_p), lambda i: (i, 0)),        # mean  (tiled over B)
            pl.BlockSpec((1, d_p), lambda i: (0, 0)),           # 1/sigma (grid-resident)
            pl.BlockSpec((_SEG_ROWS, d_p), lambda i: (0, 0)),   # segment matrix
        ],
        out_specs=pl.BlockSpec((1, _SEG_ROWS, tb_p), lambda i: (i, 0, 0)),
        compiler_params=pltpu.CompilerParams(
            # Batch axis is embarrassingly parallel -> megacore / 2-TC sharding
            # on v7x, harmless on single-TC v5e/v6e.
            dimension_semantics=("parallel",),
            vmem_limit_bytes=vmem_limit,
        ),
    )(x_p, mean_p, inv_p, seg)

    # [nb, 8, tb_p] -> [B] row sums. This relayout touches only B floats
    # (negligible vs. the 2*B*D input traffic). Trailing entries of a partial
    # last block (input boundary padding -> garbage sums) are sliced away.
    sums = jnp.transpose(sums[:, :pack, :], (0, 2, 1)).reshape(-1)[:B]
    return -0.5 * sums + const


if __name__ == "__main__":
    key = jax.random.PRNGKey(0)
    k1, k2, k3, k4, k5, k6 = jax.random.split(key, 6)

    def reference_log_prob(x, mean, scale_param):
        sig = _softplus(scale_param)[None, :]
        elem = -0.5 * ((x - mean) / sig) ** 2 - jnp.log(sig) - _HALF_LOG_2PI
        return jnp.sum(elem, axis=-1)

    # ---- main (lane-packed) path: D divides 128, multi-block grid ----
    B, D = 64, 32  # batch, var_shape=(D,), reinterpreted_batch_ndims=1
    mean = jax.random.normal(k1, (B, D), dtype=jnp.float32)
    x = mean + 0.5 * jax.random.normal(k2, (B, D), dtype=jnp.float32)
    # nn.Parameter is zero-init in the module; small perturbation so softplus is
    # exercised off the trivial point.
    scale_param = 0.1 * jax.random.normal(k3, (D,), dtype=jnp.float32)

    loc, scale = independent_normal_forward(mean, scale_param)
    lp = independent_normal_log_prob(x, mean, scale_param)
    lp_small = independent_normal_log_prob(x, mean, scale_param, block_rows=32)
    jax.block_until_ready((loc, scale, lp, lp_small))

    ref = reference_log_prob(x, mean, scale_param)
    assert loc.shape == (B, D) and scale.shape == (1, D) and lp.shape == (B,)
    assert jnp.allclose(loc, mean)
    assert jnp.allclose(scale, _softplus(scale_param)[None, :], atol=1e-6)
    assert jnp.allclose(lp, ref, atol=1e-4, rtol=1e-4)
    assert jnp.allclose(lp_small, ref, atol=1e-4, rtol=1e-4)

    # ---- fallback (zero-padded) path: D does not divide 128, partial block ----
    B2, D2 = 40, 40
    mean2 = jax.random.normal(k4, (B2, D2), dtype=jnp.float32)
    x2 = mean2 + 0.5 * jax.random.normal(k5, (B2, D2), dtype=jnp.float32)
    scale_param2 = 0.1 * jax.random.normal(k6, (D2,), dtype=jnp.float32)
    lp2 = independent_normal_log_prob(x2, mean2, scale_param2)
    jax.block_until_ready(lp2)
    ref2 = reference_log_prob(x2, mean2, scale_param2)
    assert lp2.shape == (B2,)
    assert jnp.allclose(lp2, ref2, atol=1e-4, rtol=1e-4)

    print("KERNEL_OK")
</pallas_src>

<mosaic_0001>
module attributes {stable_mosaic.version = 11 : i64} {
  func.func @_log_prob_sums_kernel(%arg0: i32, %arg1: memref<8x128xf32, #tpu.memory_space<vmem>>, %arg2: memref<8x128xf32, #tpu.memory_space<vmem>>, %arg3: memref<1x128xf32, #tpu.memory_space<vmem>>, %arg4: memref<8x128xf32, #tpu.memory_space<vmem>>, %arg5: memref<1x8x8xf32, #tpu.memory_space<vmem>>) attributes {dimension_semantics = [#tpu.dimension_semantics<parallel>], iteration_bounds = array<i64: 2>, scalar_prefetch = 0 : i64, scratch_operands = 0 : i64, tpu.core_type = #tpu.core_type<tc>, window_params = [{transform_indices = @transform_0, window_bounds = array<i64: 8, 128>}, {transform_indices = @transform_1, window_bounds = array<i64: 8, 128>}, {pipeline_mode = #tpu.pipeline_mode<synchronous>, transform_indices = @transform_2, window_bounds = array<i64: 1, 128>}, {pipeline_mode = #tpu.pipeline_mode<synchronous>, transform_indices = @transform_3, window_bounds = array<i64: 8, 128>}, {transform_indices = @transform_4, window_bounds = array<i64: 1, 8, 8>}]} {
    %c0 = arith.constant 0 : index
    %c0_0 = arith.constant 0 : index
    %0 = vector.load %arg1[%c0, %c0_0] : memref<8x128xf32, #tpu.memory_space<vmem>>, vector<8x128xf32>
    %c0_1 = arith.constant 0 : index
    %c0_2 = arith.constant 0 : index
    %1 = vector.load %arg2[%c0_1, %c0_2] : memref<8x128xf32, #tpu.memory_space<vmem>>, vector<8x128xf32>
    %2 = arith.subf %0, %1 : vector<8x128xf32>
    %c0_3 = arith.constant 0 : index
    %c0_4 = arith.constant 0 : index
    %3 = vector.load %arg3[%c0_3, %c0_4] : memref<1x128xf32, #tpu.memory_space<vmem>>, vector<1x128xf32>
    %4 = vector.broadcast %3 : vector<1x128xf32> to vector<8x128xf32>
    %5 = arith.mulf %2, %4 : vector<8x128xf32>
    %c0_5 = arith.constant 0 : index
    %c0_6 = arith.constant 0 : index
    %6 = vector.load %arg4[%c0_5, %c0_6] : memref<8x128xf32, #tpu.memory_space<vmem>>, vector<8x128xf32>
    %7 = arith.mulf %5, %5 : vector<8x128xf32>
    %cst = arith.constant dense<0.000000e+00> : vector<8x8xf32>
    %8 = tpu.matmul %6, %7, %cst {dimension_numbers = #tpu.dot_dimension_numbers<[1], [1], [0], [0], [0, 0, 1, 0], [], []>} : vector<8x128xf32>, vector<8x128xf32>, vector<8x8xf32> -> vector<8x8xf32>
    %9 = vector.shape_cast %8 : vector<8x8xf32> to vector<1x8x8xf32>
    %c0_7 = arith.constant 0 : index
    %c0_8 = arith.constant 0 : index
    %c0_9 = arith.constant 0 : index
    %10 = vector.load %arg5[%c0_7, %c0_8, %c0_9] : memref<1x8x8xf32, #tpu.memory_space<vmem>>, vector<1x8x8xf32>
    tpu.vector_store %arg5[%c0_7, %c0_8, %c0_9], %9 {strides = array<i32>} : memref<1x8x8xf32, #tpu.memory_space<vmem>>, vector<1x8x8xf32>,
    return
  }
  func.func @transform_0(%arg0: i32) -> (i32, i32) {
    %c0_i32 = arith.constant 0 : i32
    %c0_i32_0 = arith.constant 0 : i32
    return %arg0, %c0_i32 : i32, i32
  }
  func.func @transform_1(%arg0: i32) -> (i32, i32) {
    %c0_i32 = arith.constant 0 : i32
    %c0_i32_0 = arith.constant 0 : i32
    return %arg0, %c0_i32 : i32, i32
  }
  func.func @transform_2(%arg0: i32) -> (i32, i32) {
    %c0_i32 = arith.constant 0 : i32
    %c0_i32_0 = arith.constant 0 : i32
    %c0_i32_1 = arith.constant 0 : i32
    return %c0_i32, %c0_i32_0 : i32, i32
  }
  func.func @transform_3(%arg0: i32) -> (i32, i32) {
    %c0_i32 = arith.constant 0 : i32
    %c0_i32_0 = arith.constant 0 : i32
    %c0_i32_1 = arith.constant 0 : i32
    return %c0_i32, %c0_i32_0 : i32, i32
  }
  func.func @transform_4(%arg0: i32) -> (i32, i32, i32) {
    %c0_i32 = arith.constant 0 : i32
    %c0_i32_0 = arith.constant 0 : i32
    %c0_i32_1 = arith.constant 0 : i32
    return %arg0, %c0_i32, %c0_i32_0 : i32, i32, i32
  }
}

</mosaic_0001>

<bundles_post_ra>
// kernel: tpu_custom_call.1
= control target key start
LH: loop header
LB: loop body
LE: loop exit
PB: predicated region body
PF: predicated region fallthrough
CT: control target
= control target key end

     0   :  { %s964_s0 = inlined_call_operand.hbm [shape: f32[16,128], index: 0, kind: input, shape index: {}]   ;;  %s965_s1 = inlined_call_operand.hbm [shape: f32[16,128], index: 1, kind: input, shape index: {}]   ;;  %s966_s2 = inlined_call_operand.vmem [shape: f32[1,128], index: 2, kind: input, shape index: {}]   ;;  %s967_s3 = inlined_call_operand.hbm [shape: f32[8,128], index: 3, kind: input, shape index: {}]   ;;  %s968_s4 = inlined_call_operand.hbm [shape: f32[2,8,8], index: 4, kind: output, shape index: {}]  }
   0x1   :  { %973 = sst [smem:[#allocation13_spill]] %s967_s3 }
   0x2   :  { %9 = vsyncpa [#allocation3], 0 }
   0x3   :  { %11 = vsyncpa [#allocation3 + $0x1], 0 }
   0x4   :  { %12 = vsyncpa [#allocation6], 0 }
   0x5   :  { %14 = vsyncpa [#allocation6 + $0x1], 0 }
   0x6   :  { %15 = vsyncpa [#allocation4], 0 }
   0x7   :  { %17 = vsyncpa [#allocation4 + $0x1], 0  ;;  %s739_s15 = smov 0   ;;  %s741_s16 = smov 0  }
   0x8   :  { %s743_s17 = smov 0   ;;  %s745_s18 = smov 0  }
   0x9 LB: > { %s760_s19 = sadd.s32 4294967295, %s706_s18   ;;  %s463_s20 = sadd.s32 4294967294, %s706_s18   ;;  %s706_s18 = sphi %s745_s18, %s993_s18   ;;  %s702_s17 = sphi %s743_s17, %s992_s17   ;;  %s698_s16 = sphi %s741_s16, %s991_s16   ;;  %s694_s15 = sphi %s739_s15, %s990_s15  }
   0xa   : > { %p43_p0 = scmp.ne.s32.totalorder %s698_s16, %s694_s15  ;;  %p969_p1 = scmp.eq.s32.totalorder %s760_s19, 0 }
   0xb   : > { %p141_p3 = scmp.eq.s32.totalorder %s463_s20, 1  ;;  %p464_p5 = scmp.ge.s32.totalorder %s706_s18, 1 }
   0xc   : > { %p769_p4 = por %p969_p1, %p43_p0  ;;  %p148_p7 = scmp.lt.s32.totalorder %s706_s18, 3 }
   0xd   : > { %p774_p6 = por %p141_p3, %p43_p0  ;;  %s708_s24 = smov [#allocation7]  }
   0xe   : > { %s974_s21 = scalar_select %p769_p4, 1, 0 }
   0xf   : > { %s975_s22 = scalar_select %p774_p6, 1, 0 }
  0x10   : > { %p779_p8 = pnand %p464_p5, %p148_p7  ;;  %s164_s25 = sshll.u32 %s708_s24, 4  ;;  %s165_s25 = int_to_ptr.vmem [resolvable:$true] %s164_s25 }
  0x11   : > { %s787_s26 = sadd.s32 1, %s706_s18   ;;  %s30_s30 = sadd.s32 1, %s702_s17 }
  0x12   : > { %s976_s23 = scalar_select %p779_p8, 1, 0 }
  0x13   : > { %p498_p10 = pneg %p779_p8  ;;  %s27_s28 = ssub.s32 %s706_s18, %s787_s26 }
  0x14   : > { %p797_p12 = scmp.eq.s32.totalorder %s27_s28, 0  ;;  %p37_p13 = scmp.ne.s32.totalorder %s702_s17, %s698_s16 }
  0x15   : > { %p791_p11 = pnand %p498_p10, %p969_p1  ;;  %s563_s5 = scalar_lea.vmem %s165_s25, 128 }
  0x16   : > { %p564_p3 = scmp.ne.s32.totalorder %s165_s25, %s563_s5  ;;  %p571_p9 = scmp.lt.s32.totalorder %s165_s25, %s165_s25 }
  0x17   : > { %p554_p0 = pneg %p791_p11  ;;  %p572_p2 = scmp.lt.s32.totalorder %s563_s5, %s563_s5 }
  0x19   : > { %p566_p5 = pnand %p564_p3, %p554_p0  ;;  %p573_p10 = por %p572_p2, %p571_p9 }
  0x1b   : > { %p567_p7 = pneg %p566_p5 }
  0x1d   : > { %p574_p1 = pnand %p573_p10, %p567_p7 }
  0x1f   : > { %577 = shalt.err (!%p574_p1)
}
  0x20   : > { %s979_s3 = sld [smem:[#allocation13_spill]]  ;;  %p38_p1 = scmp.eq.s32.totalorder %s706_s18, 0 }
  0x21   : > { %s814_s8 = scalar_select %p797_p12, %s702_s17, %s30_s30  }
  0x22   : > { %p980_p2 = scmp.eq.s32.totalorder %s760_s19, 1  ;;  %p514_p0 = scmp.lt.s32.totalorder %s706_s18, 2 }
  0x23   : > { %s175_s10 = sand.u32 1, %s702_s17   ;;  %p39_p3 = por %p38_p1, %p37_p13 }
  0x24   : > { %p822_p9 = por %p980_p2, %p37_p13  ;;  %s831_s11 = sshll.u32 %s175_s10, 3 }
  0x25   : > { %s468_s12 = sshll.u32 %s706_s18, 7  ;;  %s179_s24 = scalar_lea.vmem [#allocation2], %s831_s11 }
  0x26   : > { %501 = dma.hbm_to_vmem [thread:$0]  (!%p791_p11), %s979_s3, 128, %s165_s25, [#allocation6]  }
  0x27   : > { %s981_s9 = scalar_select %p822_p9, 1, 0 }
  0x28   : > { %s837_s20 = scalar_lea.hbm %s964_s0, %s468_s12  ;;  %s186_s25 = sshll.u32 %s179_s24, 4  ;;  %s187_s25 = int_to_ptr.vmem [resolvable:$true] %s186_s25 }
  0x29   : > { %p840_p11 = pnand %p514_p0, %p39_p3  ;;  %s847_s30 = scalar_lea.hbm %s965_s1, %s468_s12 }
  0x2a   : > { %s176_s5 = scalar_lea.sflag [#allocation3], %s175_s10  ;;  %s578_s6 = scalar_lea.hbm %s837_s20, 128 }
  0x2b   : > { %p579_p12 = scmp.ne.s32.totalorder %s837_s20, %s578_s6  ;;  %p580_p13 = pneg %p840_p11 }
  0x2c   : > { %s583_s14 = scalar_lea.hbm %s964_s0, 256  ;;  %p584_p10 = scmp.lt.s32.totalorder %s837_s20, %s964_s0 }
  0x2d   : > { %p581_p5 = pnand %p580_p13, %p579_p12  ;;  %p585_p1 = scmp.lt.s32.totalorder %s583_s14, %s578_s6 }
  0x2f   : > { %p582_p7 = pneg %p581_p5  ;;  %p586_p2 = por %p585_p1, %p584_p10 }
  0x31   : > { %p587_p0 = pnand %p586_p2, %p582_p7 }
  0x33   : > { %590 = shalt.err (!%p587_p0)
}
  0x34   : > { %s591_s10 = scalar_lea.vmem %s187_s25, 128  ;;  %s709_s12 = smov [#allocation2]  }
  0x35   : > { %p592_p3 = scmp.ne.s32.totalorder %s187_s25, %s591_s10  ;;  %s596_s28 = sshll.u32 %s709_s12, 4  ;;  %s597_s28 = int_to_ptr.vmem [resolvable:$false] %s596_s28 }
  0x36   : > { %s598_s29 = scalar_lea.vmem %s597_s28, 256  ;;  %p599_p5 = scmp.lt.s32.totalorder %s187_s25, %s597_s28 }
  0x37   : > { %p594_p6 = pnand %p592_p3, %p580_p13  ;;  %p600_p9 = scmp.lt.s32.totalorder %s598_s29, %s591_s10 }
  0x39   : > { %p595_p12 = pneg %p594_p6  ;;  %p601_p4 = por %p600_p9, %p599_p5 }
  0x3b   : > { %p602_p8 = pnand %p601_p4, %p595_p12 }
  0x3d   : > { %605 = shalt.err (!%p602_p8)
}
  0x3e   : > { %505 = dma.hbm_to_vmem [thread:$0]  (!%p840_p11), %s837_s20, 128, %s187_s25, %s176_s5  }
  0x3f   : > { %s193_s3 = sand.u32 1, %s706_s18   ;;  %s197_s6 = scalar_lea.vmem [#allocation5], %s831_s11 }
  0x40   : > { %s204_s7 = sshll.u32 %s197_s6, 4  ;;  %s194_s13 = scalar_lea.sflag [#allocation6], %s193_s3  ;;  %s205_s7 = int_to_ptr.vmem [resolvable:$true] %s204_s7 }
  0x41   : > { %s606_s14 = scalar_lea.hbm %s847_s30, 128  ;;  %s611_s12 = scalar_lea.hbm %s965_s1, 256 }
  0x42   : > { %p607_p6 = scmp.ne.s32.totalorder %s847_s30, %s606_s14  ;;  %p612_p9 = scmp.lt.s32.totalorder %s847_s30, %s965_s1 }
  0x43   : > { %p613_p7 = scmp.lt.s32.totalorder %s611_s12, %s606_s14 }
  0x44   : > { %p609_p4 = pnand %p607_p6, %p580_p13 }
  0x45   : > { %p614_p10 = por %p613_p7, %p612_p9 }
  0x46   : > { %p610_p8 = pneg %p609_p4 }
  0x48   : > { %p615_p1 = pnand %p614_p10, %p610_p8 }
  0x4a   : > { %618 = shalt.err (!%p615_p1)
}
  0x4b   : > { %s619_s11 = scalar_lea.vmem %s205_s7, 128  ;;  %s710_s20 = smov [#allocation5]  }
  0x4c   : > { %p620_p2 = scmp.ne.s32.totalorder %s205_s7, %s619_s11  ;;  %s624_s25 = sshll.u32 %s710_s20, 4  ;;  %s625_s25 = int_to_ptr.vmem [resolvable:$false] %s624_s25 }
  0x4d   : > { %s626_s5 = scalar_lea.vmem %s625_s25, 256  ;;  %p627_p12 = scmp.lt.s32.totalorder %s205_s7, %s625_s25 }
  0x4e   : > { %p622_p0 = pnand %p620_p2, %p580_p13  ;;  %p628_p5 = scmp.lt.s32.totalorder %s626_s5, %s619_s11 }
  0x50   : > { %p623_p3 = pneg %p622_p0  ;;  %p629_p6 = por %p628_p5, %p627_p12 }
  0x52   : > { %p630_p4 = pnand %p629_p6, %p623_p3 }
  0x54   : > { %633 = shalt.err (!%p630_p4)
}
  0x55   : > { %508 = dma.hbm_to_vmem [thread:$0]  (!%p840_p11), %s847_s30, 128, %s205_s7, %s194_s13  }
  0x56   : > { %p983_p8 = scmp.ne.s32.totalorder %s976_s23, 0 }
  0x57   : > { %s892_s3 = sand.u32 (!%p983_p8), 1, %s698_s16   ;;  %p984_p13 = scmp.ne.s32.totalorder (!%p983_p8), %s974_s21, 0 }
  0x58   : > { %213 = sbr.rel (%p983_p8) target bundleno = 317 (0x13d), region = 36  ;;  %s895_s6 = sshll.u32 (!%p983_p8), %s892_s3, 3 }
  0x59   : > { %s216_s14 = scalar_lea.sflag (!%p983_p8), [#allocation3], %s892_s3  ;;  %s219_s24 = scalar_lea.vmem (!%p983_p8), [#allocation2], %s895_s6 }
  0x5d   : > { %677 = dma.done.wait (%p984_p13), %s216_s14, 128  }
  0x5e   : > { %679 = vsyncadd (%p984_p13), %s216_s14, 4294967168  ;;  %s224_s23 = sand.u32 1, %s760_s19   ;;  %s228_s30 = scalar_lea.vmem [#allocation5], %s895_s6 }
  0x5f   : > { %s225_s27 = scalar_lea.sflag [#allocation6], %s224_s23 }
  0x60   : > { %681 = dma.done.wait (%p984_p13), %s225_s27, 128  }
  0x61   : > { %683 = vsyncadd (%p984_p13), %s225_s27, 4294967168  ;;  %p985_p11 = scmp.eq.s32.totalorder %s760_s19, 0 }
  0x63   : > { %685 = dma.done.wait (%p985_p11), [#allocation6], 128   ;;  %p986_p9 = pmov %p985_p11 }
  0x64   : > { %v711_v0 = vmov 0.0   ;;  %vm712_vm0 = vmmov 0   ;;  %v262_v1 = vld [vmem:[%s219_s24] sm:$0xff]  ;;  %v263_v2 = vld [vmem:[%s228_s30] sm:$0xff]  ;;  %s478_s21 = sshll.u32 %s760_s19, 7  ;;  %s261_s10 = scalar_lea.vmem [#allocation8], %s895_s6 }
  0x65   : > { %687 = vsyncadd (%p986_p9), [#allocation6], 4294967168  ;;  %483 = vmatprep.subr.mxu0 %v711_v0  ;;  %485 = vmatprep.mubr.msk.f32.mxu0 %vm712_vm0, %v711_v0  ;;  %v476_v3 = vld [vmem:[%s966_s2] ss:$0 sm:$0xff]  ;;  %v264_v4 = vsub.f32 %v262_v1, %v263_v2  ;;  %s361_s12 = sshll.u32 %s261_s10, 4  ;;  %vm345_vm1 = vcmask 64512   ;;  %s921_s11 = scalar_lea.hbm %s968_s4, %s478_s21  ;;  %s923_s12 = int_to_ptr.vmem [resolvable:$true] %s361_s12 }
  0x66   : > { %v273_v7 = vld [vmem:[#allocation7] sm:$0xff]  ;;  %s348_s20 = scalar_lea.sflag [#allocation4], %s892_s3  ;;  %s634_s25 = scalar_lea.vmem %s923_s12, 128 }
  0x67   : > { %v272_v5 = vmul.f32 %v476_v3, %v264_v4  ;;  %p635_p7 = scmp.ne.s32.totalorder %s923_s12, %s634_s25  ;;  %p987_p10 = scmp.ne.s32.totalorder %s981_s9, 0 }
  0x68   : > { %s713_s19 = smov [#allocation8]  }
  0x69   : > { %v274_v6 = vmul.f32 %v272_v5, %v272_v5  ;;  %p636_p1 = pnand %p635_p7, %p987_p10  ;;  %s638_s5 = sshll.u32 %s713_s19, 4  ;;  %s639_s5 = int_to_ptr.vmem [resolvable:$false] %s638_s5 }
  0x6a   : > { %s640_s6 = scalar_lea.vmem %s639_s5, 256  ;;  %p641_p0 = scmp.lt.s32.totalorder %s923_s12, %s639_s5 }
  0x6b   : > { %484 = vmatpush3.xpose.msra.mxu0 %v274_v6  ;;  %p637_p2 = pneg %p636_p1  ;;  %p642_p3 = scmp.lt.s32.totalorder %s640_s6, %s634_s25 }
  0x6d   : > { %p643_p12 = por %p642_p3, %p641_p0 }
  0x6e   : > { %486 = vmatmul.mubr.f32.vlgmr.msra.gmra.mxu0 %v273_v7 }
  0x6f   : > { %p644_p5 = pnand %p643_p12, %p637_p2 }
 0x12e   : > { %v341_v8 = vpop.f32.mrf.mxu0 }
 0x12f   : > { %346 = vst.msk [vmem:[%s261_s10] sm:$0xff] %vm345_vm1, %v341_v8 }
 0x130   : > { %v487_v9 = vpop.f32.mrf.mxu0 }
 0x131   : > { %647 = shalt.err (!%p644_p5)
}
 0x132   : > { %s648_s14 = scalar_lea.hbm %s921_s11, 128  ;;  %s652_s23 = scalar_lea.hbm %s968_s4, 256 }
 0x133   : > { %p649_p6 = scmp.ne.s32.totalorder %s921_s11, %s648_s14  ;;  %p653_p13 = scmp.lt.s32.totalorder %s921_s11, %s968_s4 }
 0x134   : > { %p654_p11 = scmp.lt.s32.totalorder %s652_s23, %s648_s14 }
 0x135   : > { %p650_p4 = pnand %p649_p6, %p987_p10 }
 0x136   : > { %p655_p9 = por %p654_p11, %p653_p13 }
 0x137   : > { %p651_p8 = pneg %p650_p4 }
 0x139   : > { %p656_p7 = pnand %p655_p9, %p651_p8 }
 0x13b   : > { %659 = shalt.err (!%p656_p7)
}
 0x13c   : > { %496 = dma.vmem_to_hbm [thread:$0]  (%p987_p10), %s923_s12, 128, %s921_s11, %s348_s20  }
 0x13d PF: > { %s373_s7 = sand.u32 1, %s694_s15   ;;  %p988_p1 = scmp.ne.s32.totalorder %s975_s22, 0 }
 0x13e   : > { %p989_p2 = scmp.ge.s32.totalorder %s706_s18, 2  ;;  %s374_s13 = scalar_lea.sflag [#allocation4], %s373_s7 }
 0x140   : > { %p510_p0 = pnand %p989_p2, %p988_p1 }
 0x142   : > { %p511_p3 = pneg %p510_p0 }
 0x144   : > { %689 = dma.done.wait (%p511_p3), %s374_s13, 128  }
 0x145   : > { %691 = vsyncadd (%p511_p3), %s374_s13, 4294967168  ;;  %p20_p12 = scmp.ge.s32.totalorder %s787_s26, 4   ;;  %s990_s15 = smov %s698_s16 }
 0x146   : > { %s991_s16 = smov %s702_s17  ;;  %s992_s17 = smov %s814_s8 }
 0x147   : > { %s993_s18 = smov %s787_s26  ;;  %22 = sbr.rel (!%p20_p12) target bundleno = 9 (0x9), region = 98 }
 0x14c   :  { %379 = vsyncpa [#allocation3], 1 }
 0x14d   :  { %381 = vsyncpa [#allocation3 + $0x1], 1 }
 0x14e   :  { %382 = vsyncpa [#allocation6], 1 }
 0x14f   :  { %384 = vsyncpa [#allocation6 + $0x1], 1 }
 0x150   :  { %385 = vsyncpa [#allocation4], 1 }
 0x151   :  { %387 = vsyncpa [#allocation4 + $0x1], 1 }

</bundles_post_ra>
